<compile_context>
chip_gen: v7x
topology: tpu7x:2x2x1
jax: 0.10.0
libtpu: 0.0.40
codegen_flags: <defaults>
</compile_context>

<pallas_src>
import functools
import math

import jax
import jax.numpy as jnp
from jax import lax
from jax.experimental import pallas as pl
from jax.experimental.pallas import tpu as pltpu


def _ntk_bias_kernel(x_ref, w_ref, b_ref, o_ref, *, stdv, beta):
    # x_ref: (tm, tk), w_ref: (tn, tk), b_ref: (1, tn), o_ref: (tm, tn) f32
    k = pl.program_id(2)
    nk = pl.num_programs(2)

    # x @ W^T with W stored (N, K): contract dim 1 of both operands on the MXU.
    part = lax.dot_general(
        x_ref[...], w_ref[...],
        dimension_numbers=(((1,), (1,)), ((), ())),
        preferred_element_type=jnp.float32,
    )

    @pl.when(k == 0)
    def _():
        o_ref[...] = part

    @pl.when(k > 0)
    def _():
        o_ref[...] += part

    @pl.when(k == nk - 1)
    def _():
        o_ref[...] = o_ref[...] * stdv + b_ref[...].astype(jnp.float32) * beta


def _ntk_nobias_kernel(x_ref, w_ref, o_ref, *, stdv):
    k = pl.program_id(2)
    nk = pl.num_programs(2)

    part = lax.dot_general(
        x_ref[...], w_ref[...],
        dimension_numbers=(((1,), (1,)), ((), ())),
        preferred_element_type=jnp.float32,
    )

    @pl.when(k == 0)
    def _():
        o_ref[...] = part

    @pl.when(k > 0)
    def _():
        o_ref[...] += part

    @pl.when(k == nk - 1)
    def _():
        o_ref[...] = o_ref[...] * stdv


def _round_up(x, m):
    return ((x + m - 1) // m) * m


def _pick_k_tiling(K, cap):
    """Return (tk, Kp). If K fits in one block, tk = K (full dim, no padding).
    Otherwise tk is the largest multiple of 128 <= cap dividing the
    128-rounded K; Kp is the (possibly padded) contraction length."""
    if K <= cap:
        return K, K
    Kp = _round_up(K, 128)
    tk = 128
    t = (cap // 128) * 128
    while t >= 128:
        if Kp % t == 0:
            tk = t
            break
        t -= 128
    return tk, Kp


def ntk_linear(x, weight, bias=None, beta=0.1, compute_dtype=None, block_k=None):
    """NTKLinear forward.

    x: (M, K), weight: (N, K), bias: (N,) or None.
    compute_dtype: optional MXU streaming dtype (e.g. jnp.bfloat16). Accumulation
      is always f32 and the output is f32 (matching the module's f32 params).
    block_k: optional override of the K-tile cap (mainly for testing).
    """
    M, K = x.shape
    N, K2 = weight.shape
    assert K == K2, f"in_features mismatch: {K} vs {K2}"
    stdv = math.sqrt(1.0 - beta * beta) / math.sqrt(float(K))

    in_dtype = jnp.dtype(compute_dtype) if compute_dtype is not None else jnp.dtype(x.dtype)
    in_bytes = in_dtype.itemsize
    x_c = x.astype(in_dtype)
    w_c = weight.astype(in_dtype)

    # Sublane packing: 8 rows per vreg for 4-byte, 16 for 2-byte dtypes.
    sublane = max(8, 32 // in_bytes)

    # --- Tile selection -----------------------------------------------------
    tm = min(512, _round_up(M, sublane))
    if tm > M:
        tm = M            # block equal to the full M dim is always legal
    tn = min(512, _round_up(N, 128))
    if tn > N:
        tn = N            # block equal to the full N dim is always legal
    tk_cap = block_k if block_k is not None else (2048 if in_bytes <= 2 else 1024)
    tk, Kp = _pick_k_tiling(K, tk_cap)

    grid_m = pl.cdiv(M, tm)
    grid_n = pl.cdiv(N, tn)
    # v7x has 2 TensorCores: keep >= 2 blocks on a parallel axis when possible.
    if grid_m == 1 and grid_n == 1 and N >= 256:
        tn = _round_up(-(-N // 2), 128)
        grid_n = pl.cdiv(N, tn)
    grid_k = Kp // tk
    grid = (grid_m, grid_n, grid_k)

    # K-tail padding only when the contraction is split and ragged (garbage in
    # the K tail would corrupt valid outputs; M/N edges are safely masked).
    if Kp != K:
        x_c = jnp.pad(x_c, ((0, 0), (0, Kp - K)))
        w_c = jnp.pad(w_c, ((0, 0), (0, Kp - K)))

    x_spec = pl.BlockSpec((tm, tk), lambda i, j, k: (i, k))
    w_spec = pl.BlockSpec((tn, tk), lambda i, j, k: (j, k))
    out_spec = pl.BlockSpec((tm, tn), lambda i, j, k: (i, j))

    # VMEM budget: double-buffered inputs + double-buffered f32 output tile.
    ws = 2 * (tm * tk + tn * tk) * in_bytes + 2 * tm * tn * 4 + 2 * tn * 4
    vmem_limit = min(48 * 1024 * 1024, max(32 * 1024 * 1024, ws + (4 << 20)))

    cost = pl.CostEstimate(
        flops=2 * M * N * K,
        transcendentals=0,
        bytes_accessed=in_bytes * (M * K + N * K) + 4 * M * N + 4 * N,
    )

    if bias is not None:
        b_2d = bias.reshape(1, N)
        kernel = functools.partial(_ntk_bias_kernel, stdv=stdv, beta=beta)
        in_specs = [x_spec, w_spec, pl.BlockSpec((1, tn), lambda i, j, k: (0, j))]
        args = (x_c, w_c, b_2d)
    else:
        kernel = functools.partial(_ntk_nobias_kernel, stdv=stdv)
        in_specs = [x_spec, w_spec]
        args = (x_c, w_c)

    out = pl.pallas_call(
        kernel,
        out_shape=jax.ShapeDtypeStruct((M, N), jnp.float32),
        grid_spec=pltpu.PrefetchScalarGridSpec(
            num_scalar_prefetch=0,
            grid=grid,
            in_specs=in_specs,
            out_specs=out_spec,
        ),
        compiler_params=pltpu.CompilerParams(
            dimension_semantics=("parallel", "parallel", "arbitrary"),
            vmem_limit_bytes=vmem_limit,
        ),
        cost_estimate=cost,
    )(*args)
    return out


if __name__ == "__main__":
    key = jax.random.PRNGKey(0)
    k_x, k_w, k_b = jax.random.split(key, 3)

    batch = 8
    in_features = 32
    out_features = 64
    beta = 0.1

    # Deterministic "reset_parameters": weight, bias ~ N(0, 1)
    x = jax.random.normal(k_x, (batch, in_features), dtype=jnp.float32)
    weight = jax.random.normal(k_w, (out_features, in_features), dtype=jnp.float32)
    bias = jax.random.normal(k_b, (out_features,), dtype=jnp.float32)

    stdv = math.sqrt(1.0 - beta * beta) / math.sqrt(float(in_features))
    ref = x @ weight.T * stdv + bias * beta
    ref_nb = x @ weight.T * stdv

    # f32 path, bias=True
    out = jax.block_until_ready(ntk_linear(x, weight, bias, beta=beta))
    assert out.shape == (batch, out_features)
    assert jnp.allclose(out, ref, atol=1e-4, rtol=1e-4)

    # f32 path, bias=False
    out_nb = jax.block_until_ready(ntk_linear(x, weight, None, beta=beta))
    assert jnp.allclose(out_nb, ref_nb, atol=1e-4, rtol=1e-4)

    # bf16 streaming path (f32 accumulation) -> looser tolerance.
    out_bf = jax.block_until_ready(
        ntk_linear(x, weight, bias, beta=beta, compute_dtype=jnp.bfloat16))
    assert jnp.allclose(out_bf, ref, atol=2e-2, rtol=2e-2)

    # Multi K-step + ragged-N path (exercises in-place accumulation & masked edges).
    M2, K2, N2 = 16, 256, 200
    k2x, k2w, k2b = jax.random.split(jax.random.PRNGKey(1), 3)
    x2 = jax.random.normal(k2x, (M2, K2), dtype=jnp.float32)
    w2 = jax.random.normal(k2w, (N2, K2), dtype=jnp.float32)
    b2 = jax.random.normal(k2b, (N2,), dtype=jnp.float32)
    stdv2 = math.sqrt(1.0 - beta * beta) / math.sqrt(float(K2))
    out2 = jax.block_until_ready(ntk_linear(x2, w2, b2, beta=beta, block_k=128))
    ref2 = x2 @ w2.T * stdv2 + b2 * beta
    assert jnp.allclose(out2, ref2, atol=5e-4, rtol=5e-4)

    print("KERNEL_OK")
</pallas_src>

<mosaic_0001>
module attributes {stable_mosaic.version = 11 : i64} {
  func.func @_ntk_bias_kernel(%arg0: i32, %arg1: i32, %arg2: i32, %arg3: memref<8x32xf32, #tpu.memory_space<vmem>>, %arg4: memref<64x32xf32, #tpu.memory_space<vmem>>, %arg5: memref<1x64xf32, #tpu.memory_space<vmem>>, %arg6: memref<8x64xf32, #tpu.memory_space<vmem>>) attributes {dimension_semantics = [#tpu.dimension_semantics<parallel>, #tpu.dimension_semantics<parallel>, #tpu.dimension_semantics<arbitrary>], iteration_bounds = array<i64: 1, 1, 1>, scalar_prefetch = 0 : i64, scratch_operands = 0 : i64, tpu.core_type = #tpu.core_type<tc>, window_params = [{transform_indices = @transform_0, window_bounds = array<i64: 8, 32>}, {transform_indices = @transform_1, window_bounds = array<i64: 64, 32>}, {transform_indices = @transform_2, window_bounds = array<i64: 1, 64>}, {transform_indices = @transform_3, window_bounds = array<i64: 8, 64>}]} {
    %c0 = arith.constant 0 : index
    %c0_0 = arith.constant 0 : index
    %0 = vector.load %arg3[%c0, %c0_0] : memref<8x32xf32, #tpu.memory_space<vmem>>, vector<8x32xf32>
    %c0_1 = arith.constant 0 : index
    %c0_2 = arith.constant 0 : index
    %1 = vector.load %arg4[%c0_1, %c0_2] : memref<64x32xf32, #tpu.memory_space<vmem>>, vector<64x32xf32>
    %cst = arith.constant dense<0.000000e+00> : vector<8x64xf32>
    %2 = tpu.matmul %0, %1, %cst {dimension_numbers = #tpu.dot_dimension_numbers<[1], [1], [0], [0], [0, 0, 1, 0], [], []>} : vector<8x32xf32>, vector<64x32xf32>, vector<8x64xf32> -> vector<8x64xf32>
    %c0_i32 = arith.constant 0 : i32
    %3 = arith.cmpi eq, %arg2, %c0_i32 : i32
    %4 = arith.extui %3 : i1 to i32
    %c0_i32_3 = arith.constant 0 : i32
    %5 = arith.cmpi ne, %4, %c0_i32_3 : i32
    scf.if %5 {
      %c0_8 = arith.constant 0 : index
      %c0_9 = arith.constant 0 : index
      %12 = vector.load %arg6[%c0_8, %c0_9] : memref<8x64xf32, #tpu.memory_space<vmem>>, vector<8x64xf32>
      tpu.vector_store %arg6[%c0_8, %c0_9], %2 {strides = array<i32>} : memref<8x64xf32, #tpu.memory_space<vmem>>, vector<8x64xf32>,
    } else {
    }
    %c0_i32_4 = arith.constant 0 : i32
    %6 = arith.cmpi sgt, %arg2, %c0_i32_4 : i32
    %7 = arith.extui %6 : i1 to i32
    %c0_i32_5 = arith.constant 0 : i32
    %8 = arith.cmpi ne, %7, %c0_i32_5 : i32
    scf.if %8 {
      %c0_8 = arith.constant 0 : index
      %c0_9 = arith.constant 0 : index
      %12 = vector.load %arg6[%c0_8, %c0_9] : memref<8x64xf32, #tpu.memory_space<vmem>>, vector<8x64xf32>
      %13 = arith.addf %12, %2 : vector<8x64xf32>
      %c0_10 = arith.constant 0 : index
      %c0_11 = arith.constant 0 : index
      %14 = vector.load %arg6[%c0_10, %c0_11] : memref<8x64xf32, #tpu.memory_space<vmem>>, vector<8x64xf32>
      tpu.vector_store %arg6[%c0_10, %c0_11], %13 {strides = array<i32>} : memref<8x64xf32, #tpu.memory_space<vmem>>, vector<8x64xf32>,
    } else {
    }
    %c0_i32_6 = arith.constant 0 : i32
    %9 = arith.cmpi eq, %arg2, %c0_i32_6 : i32
    %10 = arith.extui %9 : i1 to i32
    %c0_i32_7 = arith.constant 0 : i32
    %11 = arith.cmpi ne, %10, %c0_i32_7 : i32
    scf.if %11 {
      %c0_8 = arith.constant 0 : index
      %c0_9 = arith.constant 0 : index
      %12 = vector.load %arg6[%c0_8, %c0_9] : memref<8x64xf32, #tpu.memory_space<vmem>>, vector<8x64xf32>
      %cst_10 = arith.constant 0.175890595 : f32
      %13 = vector.broadcast %cst_10 : f32 to vector<8x64xf32>
      %14 = arith.mulf %12, %13 : vector<8x64xf32>
      %c0_11 = arith.constant 0 : index
      %c0_12 = arith.constant 0 : index
      %15 = vector.load %arg5[%c0_11, %c0_12] : memref<1x64xf32, #tpu.memory_space<vmem>>, vector<1x64xf32>
      %cst_13 = arith.constant 1.000000e-01 : f32
      %16 = vector.broadcast %cst_13 : f32 to vector<1x64xf32>
      %17 = arith.mulf %15, %16 : vector<1x64xf32>
      %18 = vector.broadcast %17 : vector<1x64xf32> to vector<8x64xf32>
      %19 = arith.addf %14, %18 : vector<8x64xf32>
      %c0_14 = arith.constant 0 : index
      %c0_15 = arith.constant 0 : index
      %20 = vector.load %arg6[%c0_14, %c0_15] : memref<8x64xf32, #tpu.memory_space<vmem>>, vector<8x64xf32>
      tpu.vector_store %arg6[%c0_14, %c0_15], %19 {strides = array<i32>} : memref<8x64xf32, #tpu.memory_space<vmem>>, vector<8x64xf32>,
    } else {
    }
    return
  }
  func.func @transform_0(%arg0: i32, %arg1: i32, %arg2: i32) -> (i32, i32) {
    %c0_i32 = arith.constant 0 : i32
    return %arg0, %arg2 : i32, i32
  }
  func.func @transform_1(%arg0: i32, %arg1: i32, %arg2: i32) -> (i32, i32) {
    %c0_i32 = arith.constant 0 : i32
    return %arg1, %arg2 : i32, i32
  }
  func.func @transform_2(%arg0: i32, %arg1: i32, %arg2: i32) -> (i32, i32) {
    %c0_i32 = arith.constant 0 : i32
    %c0_i32_0 = arith.constant 0 : i32
    return %c0_i32, %arg1 : i32, i32
  }
  func.func @transform_3(%arg0: i32, %arg1: i32, %arg2: i32) -> (i32, i32) {
    %c0_i32 = arith.constant 0 : i32
    return %arg0, %arg1 : i32, i32
  }
}

</mosaic_0001>

<bundles_post_ra>
// kernel: tpu_custom_call.1
= control target key start
LH: loop header
LB: loop body
LE: loop exit
PB: predicated region body
PF: predicated region fallthrough
CT: control target
= control target key end

     0   :  { %vm24_vm0 = vcmask 261120   ;;  %v247_v2 = vmov 0.0|0.0   ;;  %vm248_vm2 = vmmov 0   ;;  %v249_v5 = vmov 0.0   ;;  %s328_s0 = inlined_call_operand.vmem [shape: f32[8,32], index: 0, kind: input, shape index: {}]   ;;  %s329_s1 = inlined_call_operand.vmem [shape: f32[64,32], index: 1, kind: input, shape index: {}]   ;;  %s330_s2 = inlined_call_operand.vmem [shape: f32[1,64], index: 2, kind: input, shape index: {}]   ;;  %s331_s3 = inlined_call_operand.hbm [shape: f32[8,64], index: 3, kind: output, shape index: {}]  }
   0x1   :  { %v16_v0 = vld [vmem:[%s329_s1] sm:$0xff]  ;;  %v17_v1 = vld [vmem:[%s329_s1 + $0x8] sm:$0xff]  ;;  %203 = vmatprep.subr.bf16.mxu0 %v247_v2  ;;  %vm279_vm1 = vmpackc.low %vm24_vm0, %vm24_vm0  ;;  %200 = vmatprep.mubr.msk.f32.mxu0 %vm248_vm2, %v249_v5 }
   0x2   :  { %v204_v3 = vpack.c.bf16 %v17_v1, %v16_v0 }
   0x4   :  { %206 = vmatpush3.bf16.xpose.msk.msra.mxu0 %vm279_vm1, %v204_v3 }
   0x5   :  { %8 = vsyncpa [#allocation3], 0  ;;  %207 = vmatprep.subr.bf16.mxu0 %v247_v2  ;;  %v18_v6 = vld [vmem:[%s329_s1 + $0x10] sm:$0xff]  ;;  %v19_v7 = vld [vmem:[%s329_s1 + $0x18] sm:$0xff]  ;;  %v144_v16 = vlaneseq  ;;  %vm126_vm3 = vcmask 523264  }
   0x6   :  { %v208_v8 = vpack.c.bf16 %v19_v7, %v18_v6  ;;  %v20_v9 = vld [vmem:[%s329_s1 + $0x20] sm:$0xff]  ;;  %v21_v10 = vld [vmem:[%s329_s1 + $0x28] sm:$0xff]  ;;  %v22_v12 = vld [vmem:[%s329_s1 + $0x30] sm:$0xff] }
   0x7   :  { %v212_v11 = vpack.c.bf16 %v21_v10, %v20_v9  ;;  %v23_v13 = vld [vmem:[%s329_s1 + $0x38] sm:$0xff]  ;;  %v15_v15 = vld [vmem:[%s328_s0] sm:$0xff]  ;;  %v145_v17 = vshrl.u32 %v144_v16, 7  ;;  %s250_s1 = smov [#allocation2]  }
   0x8   :  { %v216_v14 = vpack.c.bf16 %v23_v13, %v22_v12  ;;  %v141_v19 = vld [vmem:[%s330_s2] sm:$0x1]  ;;  %s158_s5 = sshll.u32 %s250_s1, 4  ;;  %s159_s5 = int_to_ptr.vmem [resolvable:$true] %s158_s5 }
   0x9   :  { %v142_v21 = vmul.f32 0.1, %v141_v19  ;;  %v146_v22 = vsub.s32 0, %v145_v17  ;;  %s223_s0 = scalar_lea.vmem %s159_s5, 128  ;;  %p228_p1 = scmp.lt.s32.totalorder %s159_s5, %s159_s5 }
   0xa   :  { %p224_p0 = scmp.ne.s32.totalorder %s159_s5, %s223_s0  ;;  %p229_p2 = scmp.lt.s32.totalorder %s223_s0, %s223_s0 }
   0xb   :  { %v147_v23 = vrot.slane %v142_v21, %v146_v22 }
   0xc   :  { %210 = vmatpush3.bf16.xpose.msk.msra.mxu0 %vm279_vm1, %v208_v8  ;;  %p230_p3 = por %p229_p2, %p228_p1 }
   0xd   :  { %211 = vmatprep.subr.bf16.mxu0 %v247_v2 }
   0xe   :  { %p231_p4 = pnand %p230_p3, %p224_p0 }
  0x14   :  { %214 = vmatpush3.bf16.xpose.msk.msra.mxu0 %vm279_vm1, %v212_v11 }
  0x15   :  { %215 = vmatprep.subr.bf16.mxu0 %v247_v2 }
  0x1c   :  { %218 = vmatpush3.bf16.xpose.msk.msra.mxu0 %vm279_vm1, %v216_v14 }
  0x23   :  { %201 = vmatmul.mubr.msk.f32.vlgmr.msra.gmra.mrb[0].mxu0 %vm24_vm0, %v15_v15 }
  0xf6   :  { %v118_v18 = vpop.f32.mrb[0].mxu0 }
  0xf7   :  { %127 = vst.msk [vmem:[#allocation2] sm:$0xff] %vm126_vm3, %v118_v18  ;;  %v202_v20 = vpop.f32.mrb[1].mxu0 }
  0xfe   :  { %v139_v24 = vld [vmem:[#allocation2] sm:$0xff] }
  0xff   :  { %v140_v25 = vmul.f32 0.1758906, %v139_v24 }
 0x101   :  { %v149_v26 = vadd.f32 %v147_v23, %v140_v25 }
 0x103   :  { %151 = vst.msk [vmem:[#allocation2] sm:$0xff] %vm126_vm3, %v149_v26 }
 0x104   :  { %234 = shalt.err (!%p231_p4)
}
 0x105   :  { %s235_s7 = scalar_lea.hbm %s331_s3, 128 }
 0x106   :  { %p236_p5 = scmp.ne.s32.totalorder %s331_s3, %s235_s7  ;;  %p239_p6 = scmp.lt.u32.totalorder %s235_s7, %s331_s3 }
 0x108   :  { %p241_p7 = pnand %p239_p6, %p236_p5 }
 0x10a   :  { %244 = shalt.err (!%p241_p7)
}
 0x10b   :  { %161 = dma.vmem_to_hbm [thread:$0]  %s159_s5, 128, %s331_s3, [#allocation3]  }
 0x10c   :  { %245 = dma.done.wait [#allocation3], 128  }
 0x10d   :  { %246 = vsyncadd [#allocation3], 4294967168 }
 0x10e   :  { %165 = vsyncpa [#allocation3], 1 }

</bundles_post_ra>
